<compile_context>
chip_gen: v5e
topology: v5e:2x2
jax: 0.10.0
libtpu: 0.0.40
codegen_flags: <defaults>
</compile_context>

<pallas_src>
import functools

import jax
import jax.numpy as jnp
from jax.experimental import pallas as pl
from jax.experimental.pallas import tpu as pltpu


def _ce_kernel(logits_ref, labels_ref, out_ref, *,
               n_total, tile_n, tiles_per_part, mask_rows):
    p = pl.program_id(0)          # parallel part (per-TensorCore chunk)
    i = pl.program_id(1)          # serial ("arbitrary") tile index inside part

    @pl.when(i == 0)
    def _init():
        out_ref[...] = jnp.zeros_like(out_ref)

    # ---- load tile, upcast once to f32 (v5e has no bf16 VPU/EUP) -----------
    x = logits_ref[...].astype(jnp.float32)                      # (tile_n, C)
    lab = labels_ref[...]                                        # (tile_n, 1)

    # ---- numerically-stable log-sum-exp per row -----------------------------
    m = jnp.max(x, axis=-1, keepdims=True)                       # (tile_n, 1)
    lse = jnp.log(jnp.sum(jnp.exp(x - m), axis=-1, keepdims=True)) + m

    # ---- gather true-class logit via one-hot compare (no dynamic gather) ----
    # lane-only iota; broadcasting happens inside the compare (cheaper than a
    # full (tile_n, C) iota every grid step).
    col = jax.lax.broadcasted_iota(jnp.int32, (1, x.shape[1]), 1)
    picked = jnp.sum(jnp.where(col == lab, x, 0.0), axis=-1, keepdims=True)

    per_row = lse - picked                                       # -log p(y)

    if mask_rows:
        # Static: only compiled in when padded rows exist (last tile ragged or
        # overflow tiles of the last parallel part).  Uses the UNclamped tile
        # index so overflow tiles are fully masked.  O(tile_n) work, not
        # O(tile_n*C); padded-row garbage never reaches the sum (select does
        # not propagate NaN/Inf from the unselected branch).
        t = p * tiles_per_part + i
        row = jax.lax.broadcasted_iota(jnp.int32, (tile_n, 1), 0) + t * tile_n
        per_row = jnp.where(row < n_total, per_row, 0.0)

    # ---- scalar partial sum into the resident lane-dense output block ------
    out_ref[...] = out_ref[...] + jnp.sum(per_row)


def _pick_tile_n(n, c, itemsize):
    """Rows per tile sized from a generation-safe VMEM byte budget.

    Per-row accounting (bytes), including lane padding of the thin buffers:
      logits block, double-buffered              : 2 * c * itemsize
      labels (tile_n,1) i32, dbl-buf, lane-padded: 2 * 128 * 4
      f32 working copies of the tile             : 2 * c * 4
      per-row f32 temporaries, lane-padded       : 2 * 128 * 4
    Budget 24 MiB keeps the working set comfortable on v7x (64 MiB physical)
    and v5e while putting the logits block itself in the ~1-4 MiB range that
    reaches >=85% of HBM roofline for small/medium C.
    """
    per_row = 2 * c * itemsize + 2 * 128 * 4 + 2 * c * 4 + 2 * 128 * 4
    budget = 24 * 1024 * 1024
    rows = budget // max(1, per_row)
    rows = max(8, rows - rows % 8)
    return rows


def cross_entropy_loss(outputs, labels, *, tile_n=None, num_parts=None):
    """Pallas equivalent of torch.nn.CrossEntropyLoss()(outputs, labels).

    outputs: (N, C) float logits; labels: (N,) integer class indices.
    Returns a scalar float32 loss (mean reduction over the global batch).
    """
    n, c = outputs.shape
    labels2d = labels.astype(jnp.int32).reshape(n, 1)
    itemsize = jnp.dtype(outputs.dtype).itemsize

    if tile_n is None:
        tile_n = _pick_tile_n(n, c, itemsize)
    if tile_n >= n:
        tile_n = n                                # single full-extent block
    else:
        tile_n = max(8, tile_n - tile_n % 8)      # sublane dim multiple of 8

    total_tiles = pl.cdiv(n, tile_n)

    # Megacore split: each part -> one TensorCore's chunk of tiles (v7x).
    if num_parts is None:
        num_parts = 2 if total_tiles >= 2 else 1
    num_parts = max(1, min(num_parts, total_tiles))
    tiles_per_part = pl.cdiv(total_tiles, num_parts)

    # Static: does any padding (ragged last tile or overflow tiles) exist?
    mask_rows = (num_parts * tiles_per_part * tile_n) > n

    def tile_idx(p, i):
        # Clamp so overflow tiles of the last part DMA in-bounds data; their
        # rows are masked out inside the kernel (mask_rows is True then).
        return jnp.minimum(p * tiles_per_part + i, total_tiles - 1)

    kernel = functools.partial(
        _ce_kernel,
        n_total=n, tile_n=tile_n,
        tiles_per_part=tiles_per_part, mask_rows=mask_rows)

    partials = pl.pallas_call(
        kernel,
        # One lane-dense (1,128) partial-sum block per parallel part.
        out_shape=jax.ShapeDtypeStruct((1, num_parts * 128), jnp.float32),
        grid=(num_parts, tiles_per_part),
        in_specs=[
            pl.BlockSpec((tile_n, c), lambda p, i: (tile_idx(p, i), 0)),
            pl.BlockSpec((tile_n, 1), lambda p, i: (tile_idx(p, i), 0)),
        ],
        out_specs=pl.BlockSpec((1, 128), lambda p, i: (0, p)),
        compiler_params=pltpu.CompilerParams(
            # batch chunks across cores; serial reduction over tiles in a chunk
            dimension_semantics=("parallel", "arbitrary"),
            vmem_limit_bytes=32 * 1024 * 1024,
        ),
    )(outputs, labels2d)

    parts = partials.reshape(num_parts, 128)[:, 0]
    # mean with the GLOBAL N (multiply by precomputed reciprocal, tiny XLA op)
    return jnp.sum(parts) * jnp.float32(1.0 / n)


def _reference(outputs, labels):
    n = outputs.shape[0]
    return jnp.mean(
        jax.nn.logsumexp(outputs, axis=-1) - outputs[jnp.arange(n), labels]
    )


if __name__ == "__main__":
    key = jax.random.PRNGKey(0)
    k1, k2, k3, k4 = jax.random.split(key, 4)

    # primary small case consistent with the module: batch=8, classes=32
    N, C = 8, 32
    outputs = jax.random.normal(k1, (N, C), dtype=jnp.float32)
    labels = jax.random.randint(k2, (N,), 0, C, dtype=jnp.int32)

    loss = cross_entropy_loss(outputs, labels)
    jax.block_until_ready(loss)
    ref = _reference(outputs, labels)
    assert jnp.allclose(loss, ref, atol=1e-5, rtol=1e-5), (loss, ref)

    # exercise the tiled + 2-part parallel + padded-tile path:
    # N=200, tile_n=64 -> 4 tiles, 2 parts x 2 tiles, 256 padded rows > 200
    N2, C2 = 200, 32
    outputs2 = jax.random.normal(k3, (N2, C2), dtype=jnp.float32)
    labels2 = jax.random.randint(k4, (N2,), 0, C2, dtype=jnp.int32)

    loss2 = cross_entropy_loss(outputs2, labels2, tile_n=64)
    jax.block_until_ready(loss2)
    ref2 = _reference(outputs2, labels2)
    assert jnp.allclose(loss2, ref2, atol=1e-5, rtol=1e-5), (loss2, ref2)

    print("KERNEL_OK")
</pallas_src>

<mosaic_0001>
module attributes {stable_mosaic.version = 11 : i64} {
  func.func @_ce_kernel(%arg0: i32, %arg1: i32, %arg2: memref<8x32xf32, #tpu.memory_space<vmem>>, %arg3: memref<8x1xi32, #tpu.memory_space<vmem>>, %arg4: memref<1x128xf32, #tpu.memory_space<vmem>>) attributes {dimension_semantics = [#tpu.dimension_semantics<parallel>, #tpu.dimension_semantics<arbitrary>], iteration_bounds = array<i64: 1, 1>, scalar_prefetch = 0 : i64, scratch_operands = 0 : i64, tpu.core_type = #tpu.core_type<tc>, window_params = [{transform_indices = @transform_0, window_bounds = array<i64: 8, 32>}, {transform_indices = @transform_1, window_bounds = array<i64: 8, 1>}, {transform_indices = @transform_2, window_bounds = array<i64: 1, 128>}]} {
    %c0_i32 = arith.constant 0 : i32
    %0 = arith.cmpi eq, %arg1, %c0_i32 : i32
    %1 = arith.extui %0 : i1 to i32
    %c0_i32_0 = arith.constant 0 : i32
    %2 = arith.cmpi ne, %1, %c0_i32_0 : i32
    scf.if %2 {
      %cst_12 = arith.constant 0.000000e+00 : f32
      %31 = vector.broadcast %cst_12 : f32 to vector<1x128xf32>
      %c0_13 = arith.constant 0 : index
      %c0_14 = arith.constant 0 : index
      %32 = vector.load %arg4[%c0_13, %c0_14] : memref<1x128xf32, #tpu.memory_space<vmem>>, vector<1x128xf32>
      tpu.vector_store %arg4[%c0_13, %c0_14], %31 {strides = array<i32>} : memref<1x128xf32, #tpu.memory_space<vmem>>, vector<1x128xf32>,
    } else {
    }
    %c0 = arith.constant 0 : index
    %c0_1 = arith.constant 0 : index
    %3 = vector.load %arg2[%c0, %c0_1] : memref<8x32xf32, #tpu.memory_space<vmem>>, vector<8x32xf32>
    %c0_2 = arith.constant 0 : index
    %c0_3 = arith.constant 0 : index
    %4 = vector.load %arg3[%c0_2, %c0_3] : memref<8x1xi32, #tpu.memory_space<vmem>>, vector<8x1xi32>
    %cst = arith.constant dense<0xFF800000> : vector<8xf32>
    %5 = vector.multi_reduction <maximumf>, %3, %cst [1] : vector<8x32xf32> to vector<8xf32>
    %6 = vector.shape_cast %5 : vector<8xf32> to vector<8x1xf32>
    %7 = vector.broadcast %6 : vector<8x1xf32> to vector<8x32xf32>
    %8 = arith.subf %3, %7 : vector<8x32xf32>
    %9 = math.exp %8 : vector<8x32xf32>
    %cst_4 = arith.constant dense<0.000000e+00> : vector<8xf32>
    %10 = vector.multi_reduction <add>, %9, %cst_4 [1] : vector<8x32xf32> to vector<8xf32>
    %11 = vector.shape_cast %10 : vector<8xf32> to vector<8x1xf32>
    %12 = math.log %11 : vector<8x1xf32>
    %13 = arith.addf %12, %6 : vector<8x1xf32>
    %14 = tpu.iota {dimensions = array<i32: 1>} : vector<1x32xi32>
    %15 = vector.broadcast %14 : vector<1x32xi32> to vector<8x32xi32>
    %16 = vector.broadcast %4 : vector<8x1xi32> to vector<8x32xi32>
    %17 = arith.cmpi eq, %15, %16 : vector<8x32xi32>
    %cst_5 = arith.constant 0.000000e+00 : f32
    %18 = vector.broadcast %cst_5 : f32 to vector<8x32xf32>
    %19 = arith.select %17, %3, %18 : vector<8x32xi1>, vector<8x32xf32>
    %cst_6 = arith.constant dense<0.000000e+00> : vector<8xf32>
    %20 = vector.multi_reduction <add>, %19, %cst_6 [1] : vector<8x32xf32> to vector<8xf32>
    %21 = vector.shape_cast %20 : vector<8xf32> to vector<8x1xf32>
    %22 = arith.subf %13, %21 : vector<8x1xf32>
    %c0_7 = arith.constant 0 : index
    %c0_8 = arith.constant 0 : index
    %23 = vector.load %arg4[%c0_7, %c0_8] : memref<1x128xf32, #tpu.memory_space<vmem>>, vector<1x128xf32>
    %24 = vector.shape_cast %22 : vector<8x1xf32> to vector<1x8x1xf32>
    %cst_9 = arith.constant dense<0.000000e+00> : vector<1xf32>
    %25 = vector.multi_reduction <add>, %24, %cst_9 [1, 2] : vector<1x8x1xf32> to vector<1xf32>
    %26 = vector.shape_cast %25 : vector<1xf32> to vector<1x1x1xf32>
    %27 = vector.extract %26[0, 0, 0] : f32 from vector<1x1x1xf32>
    %28 = vector.broadcast %27 : f32 to vector<1x128xf32>
    %29 = arith.addf %23, %28 : vector<1x128xf32>
    %c0_10 = arith.constant 0 : index
    %c0_11 = arith.constant 0 : index
    %30 = vector.load %arg4[%c0_10, %c0_11] : memref<1x128xf32, #tpu.memory_space<vmem>>, vector<1x128xf32>
    tpu.vector_store %arg4[%c0_10, %c0_11], %29 {strides = array<i32>} : memref<1x128xf32, #tpu.memory_space<vmem>>, vector<1x128xf32>,
    return
  }
  func.func @transform_0(%arg0: i32, %arg1: i32) -> (i32, i32) {
    %c1_i32 = arith.constant 1 : i32
    %0 = arith.muli %arg0, %c1_i32 : i32
    %1 = arith.addi %0, %arg1 : i32
    %c0_i32 = arith.constant 0 : i32
    %2 = arith.minsi %1, %c0_i32 : i32
    %c0_i32_0 = arith.constant 0 : i32
    %c0_i32_1 = arith.constant 0 : i32
    return %2, %c0_i32_0 : i32, i32
  }
  func.func @transform_1(%arg0: i32, %arg1: i32) -> (i32, i32) {
    %c1_i32 = arith.constant 1 : i32
    %0 = arith.muli %arg0, %c1_i32 : i32
    %1 = arith.addi %0, %arg1 : i32
    %c0_i32 = arith.constant 0 : i32
    %2 = arith.minsi %1, %c0_i32 : i32
    %c0_i32_0 = arith.constant 0 : i32
    %c0_i32_1 = arith.constant 0 : i32
    return %2, %c0_i32_0 : i32, i32
  }
  func.func @transform_2(%arg0: i32, %arg1: i32) -> (i32, i32) {
    %c0_i32 = arith.constant 0 : i32
    %c0_i32_0 = arith.constant 0 : i32
    return %c0_i32, %arg0 : i32, i32
  }
}

</mosaic_0001>

<bundles_post_ra>
// kernel: tpu_custom_call.1
= control target key start
LH: loop header
LB: loop body
LE: loop exit
PB: predicated region body
PF: predicated region fallthrough
CT: control target
= control target key end

     0   :  { %vm73_vm0 = vcmask 261120   ;;  %s206_s0 = inlined_call_operand.vmem [shape: f32[8,32], index: 0, kind: input, shape index: {}]   ;;  %s207_s1 = inlined_call_operand.vmem [shape: s32[8,1], index: 1, kind: input, shape index: {}]   ;;  %s208_s2 = inlined_call_operand.hbm [shape: f32[1,128], index: 2, kind: output, shape index: {}]  }
   0x1   :  { %v71_v0 = vld [vmem:[%s206_s0] sm:$0xff] }
   0x2   :  { %7 = vsyncpa [#allocation3], 0  ;;  %v74_v1 = vsel %vm73_vm0, %v71_v0, -inf  ;;  %v176_v2 = vmov 0   ;;  %v72_v3 = vld [vmem:[%s207_s1] sm:$0xff]  ;;  %v86_v9 = vlaneseq  ;;  %vm98_vm2 = vcmask 7168  }
   0x3   :  { %145 = vset.pattern.permute.xlu0 %v176_v2  ;;  %v177_v21 = vmov 0.0   ;;  %s178_s0 = smov [#allocation2]   ;;  %s119_s15 = sshll.u32 %s208_s2, 4  ;;  %s120_s15 = int_to_ptr.hbm [resolvable:$true] %s119_s15 }
   0x4   :  { %75 = vmax.xlane.f32.xlu0 %v74_v1  ;;  %v87_v10 = vand.u32 127, %v86_v9  ;;  %70 = vst [vmem:[#allocation2] sm:$0x1] %v177_v21  ;;  %s117_s1 = sshll.u32 %s178_s0, 4  ;;  %s118_s1 = int_to_ptr.vmem [resolvable:$true] %s117_s1 }
   0xb   :  { %v97_v29 = vld [vmem:[#allocation2] sm:$0x1] }
  0x18   :  { %89 = vperm.xlu0 %145, %v72_v3  }
  0x77   :  { %v76_v4 = vpop.xlane.xlu0 %75 }
  0x78   :  { %v77_v5 = vsub.f32 %v71_v0, %v76_v4 }
  0x7a   :  { %v78_v6 = vmul.f32 1.442695, %v77_v5 }
  0x7c   :  { %146 = vpow2.f32 %v78_v6 }
  0x82   :  { %v147_v7 = vpop.eup %146 }
  0x83   :  { %v80_v8 = vsel %vm73_vm0, %v147_v7, 0.0 }
  0x84   :  { %81 = vadd.xlane.f32.xlu1 %v80_v8 }
  0x8a   :  { %v90_v11 = vpop.permute.xlu0 %89 }
  0x8b   :  { %vm91_vm1 = vcmp.eq.s32.totalorder %v87_v10, %v90_v11 }
  0x8c   :  { %v92_v12 = vsel %vm91_vm1, %v71_v0, 0.0 }
  0x8d   :  { %v93_v13 = vsel %vm73_vm0, %v92_v12, 0.0 }
  0x8e   :  { %94 = vadd.xlane.f32.xlu1 %v93_v13 }
  0xf7   :  { %v82_v14 = vpop.xlane.xlu1 %81 }
  0xf8   :  { %148 = vlog2.f32 %v82_v14 }
  0xfe   :  { %v149_v15 = vpop.eup %148 }
  0xff   :  { %v84_v16 = vmul.f32 0.6931472, %v149_v15 }
 0x101   :  { %v85_v17 = vadd.f32 %v84_v16, %v76_v4  ;;  %v95_v18 = vpop.xlane.xlu1 %94 }
 0x103   :  { %v96_v19 = vsub.f32 %v85_v17, %v95_v18 }
 0x105   :  { %v99_v20 = vsel %vm98_vm2, %v96_v19, 0.0 }
 0x106   :  { %100 = vadd.xlane.f32.xlu2 %v99_v20 }
 0x179   :  { %v101_v22 = vpop.xlane.xlu2 %100 }
 0x17a   :  { %v102_v23 = vrot.slane %v101_v22, 4 }
 0x17c   :  { %v103_v24 = vadd.f32 %v102_v23, %v101_v22 }
 0x17e   :  { %v104_v25 = vrot.slane %v103_v24, 2 }
 0x180   :  { %v105_v26 = vadd.f32 %v104_v25, %v103_v24 }
 0x182   :  { %v106_v27 = vrot.slane %v105_v26, 1 }
 0x184   :  { %v107_v28 = vadd.f32 %v106_v27, %v105_v26 }
 0x186   :  { %140 = vpush %v107_v28 }
 0x1b7   :  { %s141_s16 = spop %140 }
 0x1b8   :  { %v109_v30 = vstv %s141_s16 }
 0x1b9   :  { %v110_v31 = vadd.f32 %v109_v30, %v97_v29 }
 0x1bb   :  { %111 = vst [vmem:[#allocation2] sm:$0x1] %v110_v31 }
 0x1bc   :  { %122 = dma.vmem_to_hbm [thread:$0]  %s118_s1, 16, %s120_s15, [#allocation3]  }
 0x1bd   :  { %174 = dma.done.wait [#allocation3], 16  }
 0x1be   :  { %175 = vsyncadd [#allocation3], 4294967280 }
 0x1bf   :  { %127 = vsyncpa [#allocation3], 1 }

</bundles_post_ra>
